<compile_context>
chip_gen: v6e
topology: v6e:2x2x1
jax: 0.10.0
libtpu: 0.0.40
codegen_flags: <defaults>
</compile_context>

<pallas_src>
import functools

import jax
import jax.numpy as jnp
from jax import lax
from jax.experimental import pallas as pl
from jax.experimental.pallas import tpu as pltpu

_LANES = 128                               # lane width of the output slab (one vreg row)
_X_TILE_BUDGET_BYTES = 8 * 1024 * 1024     # per-buffer streamed x tile (x2 for double buffering)


def _sts_kernel(x_ref, w_ref, b_ref, sec_ref, out_ref, acc_ref, *, seq_len):
    # x_ref   : (TB, TS, H)  token-embedding tile (streamed over the seq grid axis)
    # w_ref   : (H, D)       projection weight (resident, single-buffered)
    # b_ref   : (1, D)       projection bias   (resident, single-buffered)
    # sec_ref : (TB, D)      precomputed secondary_embedding tile
    # out_ref : (TB, 128)    cosine result, broadcast across lanes (lane-dense store)
    # acc_ref : (TB, H) f32  running sum over the sequence (VMEM scratch)
    si = pl.program_id(1)
    n_seq = pl.num_programs(1)

    @pl.when(si == 0)
    def _init():
        acc_ref[...] = jnp.zeros_like(acc_ref)

    # Pool-before-project: accumulate the sequence sum of x in f32 (works for
    # f32 or bf16 inputs; bf16 halves HBM traffic, accumulation stays f32).
    acc_ref[...] += jnp.sum(x_ref[...].astype(jnp.float32), axis=1)   # (TB, H)

    @pl.when(si == n_seq - 1)
    def _finalize():
        pooled = acc_ref[...] * jnp.float32(1.0 / seq_len)            # mean pool -> (TB, H)
        w = w_ref[...].astype(jnp.float32)
        b = b_ref[...].astype(jnp.float32)
        # Single small MXU matmul per batch tile (S-fold fewer FLOPs than project-then-pool).
        primary = jnp.dot(pooled, w, preferred_element_type=jnp.float32) + b  # (TB, D)
        sec = sec_ref[...].astype(jnp.float32)

        # torch cosine_similarity semantics: clamp the PRODUCT of squared norms
        # at eps^2, then rsqrt (EUP) instead of sqrt + divide.
        eps = jnp.float32(1e-8)
        dot = jnp.sum(primary * sec, axis=-1, keepdims=True)          # (TB, 1)
        p_sq = jnp.sum(primary * primary, axis=-1, keepdims=True)     # (TB, 1)
        s_sq = jnp.sum(sec * sec, axis=-1, keepdims=True)             # (TB, 1)
        denom_sq = jnp.maximum(p_sq * s_sq, eps * eps)
        cos = dot * lax.rsqrt(denom_sq)                               # (TB, 1)
        out_ref[...] = jnp.broadcast_to(cos, out_ref.shape)           # lane-dense store


def _largest_divisor(n, upper, multiple):
    """Largest divisor of n that is <= upper and a multiple of `multiple` (None if none)."""
    upper = min(upper, n)
    for t in range(upper, 0, -1):
        if n % t == 0 and t % multiple == 0:
            return t
    return None


def _build_call(B, S, H, D, TB, TS, x_dtype, w_dtype, sec_dtype, seq_len,
                single_buffer_weights):
    """Construct the pallas_call for the given tiling."""
    x_item = jnp.dtype(x_dtype).itemsize
    w_item = jnp.dtype(w_dtype).itemsize
    sec_item = jnp.dtype(sec_dtype).itemsize

    if single_buffer_weights and hasattr(pl, "Buffered"):
        # Constant block index across the whole grid -> double-buffering is pure VMEM waste.
        w_spec = pl.BlockSpec((H, D), lambda bi, si: (0, 0), pipeline_mode=pl.Buffered(1))
        b_spec = pl.BlockSpec((1, D), lambda bi, si: (0, 0), pipeline_mode=pl.Buffered(1))
        w_bufs = 1
    else:
        w_spec = pl.BlockSpec((H, D), lambda bi, si: (0, 0))
        b_spec = pl.BlockSpec((1, D), lambda bi, si: (0, 0))
        w_bufs = 2

    # Explicit VMEM budget: streamed x (2 buffers) + weights + bias + sec + out + acc,
    # plus headroom.  Clamped to v7x's 64 MiB physical VMEM.
    vmem_need = (
        2 * TB * TS * H * x_item            # streamed x, double-buffered
        + w_bufs * H * D * w_item           # projection weight
        + w_bufs * D * w_item               # bias
        + 2 * TB * D * sec_item             # secondary embedding tile
        + 2 * TB * _LANES * 4               # output slab
        + TB * H * 4                        # f32 accumulator scratch
    )
    vmem_limit = min(max(int(vmem_need * 1.25) + (4 << 20), 16 << 20), 64 << 20)

    # Advisory cost: memory-bound streaming of x dominates.
    bytes_accessed = (B * S * H * x_item + H * D * w_item + D * w_item
                      + B * D * sec_item + B * _LANES * 4)
    flops = B * S * H + 2 * B * H * D + 8 * B * D

    kernel = functools.partial(_sts_kernel, seq_len=seq_len)
    return pl.pallas_call(
        kernel,
        out_shape=jax.ShapeDtypeStruct((B, _LANES), jnp.float32),
        grid_spec=pltpu.PrefetchScalarGridSpec(
            num_scalar_prefetch=0,
            grid=(B // TB, S // TS),  # seq axis last => trailing reduction axis
            in_specs=[
                pl.BlockSpec((TB, TS, H), lambda bi, si: (bi, si, 0)),  # streamed x
                w_spec,                                                  # resident W
                b_spec,                                                  # resident b
                pl.BlockSpec((TB, D), lambda bi, si: (bi, 0)),           # per batch tile
            ],
            out_specs=pl.BlockSpec((TB, _LANES), lambda bi, si: (bi, 0)),
            scratch_shapes=[pltpu.VMEM((TB, H), jnp.float32)],
        ),
        compiler_params=pltpu.CompilerParams(
            # batch tiles shard across TensorCores (v7x megacore); seq axis is the
            # in-order reduction into the accumulator.
            dimension_semantics=("parallel", "arbitrary"),
            vmem_limit_bytes=vmem_limit,
        ),
        cost_estimate=pl.CostEstimate(
            flops=flops, transcendentals=0, bytes_accessed=bytes_accessed),
    )


def sts_explain_forward(x, w, b, secondary, *, batch_tile=None, seq_tile=None,
                        x_tile_budget_bytes=_X_TILE_BUDGET_BYTES):
    """Pallas equivalent of STS_ExplainWrapper.forward.

    x         : (B, S, H) f32/bf16 -- `inputs` (primary / post-content token embeddings)
    w, b      : projection parameters of the synthetic RepresentationModel
    secondary : (B, D) -- precomputed secondary_embedding (claim embedding)
    returns   : (B,) f32 cosine similarities
    """
    B, S, H = x.shape
    H_w, D = w.shape
    assert H_w == H
    b2 = b.reshape(1, D)

    x_item = jnp.dtype(x.dtype).itemsize
    mult = 16 if x_item == 2 else 8  # bf16 sublane packing wants multiples of 16

    # Batch tile: as big as possible while guaranteeing >=2 tiles on the parallel
    # axis when B >= 16 (keeps both v7x TensorCores busy); otherwise the whole batch.
    if batch_tile is None:
        if B % 8 == 0 and B >= 16:
            half = B // 2
            batch_tile = half if half % 8 == 0 else 8
        else:
            batch_tile = B
    TB = batch_tile
    assert B % TB == 0 and (TB == B or TB % 8 == 0)

    # Sequence tile: largest aligned DIVISOR of S whose x tile fits the per-buffer
    # budget (double-buffered by the pipeline). Never silently fall back to full S
    # unless S has no aligned divisor at all.
    if seq_tile is None:
        bytes_per_seq_row = TB * H * x_item
        target = max(mult, x_tile_budget_bytes // max(bytes_per_seq_row, 1))
        ts = _largest_divisor(S, target, mult)
        if ts is None and mult == 16:
            ts = _largest_divisor(S, target, 8)
        if ts is None:
            # No 8-aligned divisor of S exists below the budget: a block dim equal to
            # the full array dim is the only legal choice left.
            ts = S
        seq_tile = ts
    TS = seq_tile
    assert S % TS == 0

    args = (B, S, H, D, TB, TS, x.dtype, w.dtype, secondary.dtype, S)
    try:
        call = _build_call(*args, single_buffer_weights=True)
        out = call(x, w, b2, secondary)
    except Exception:
        # Fallback if single-buffered (Buffered(1)) resident specs are unsupported.
        call = _build_call(*args, single_buffer_weights=False)
        out = call(x, w, b2, secondary)
    return out[:, 0]


if __name__ == "__main__":
    # Small but lane-aligned shapes: batch=2, seq=64, hidden=128, embed dim=128.
    # seq_tile=16 -> grid (1, 4) so the accumulator / pipelined-reduction path
    # is actually exercised.
    B, S, H, D = 2, 64, 128, 128

    key = jax.random.PRNGKey(0)
    k_x, k_w, k_b, k_sec = jax.random.split(key, 4)

    x = jax.random.normal(k_x, (B, S, H), dtype=jnp.float32)          # primary inputs
    w = jax.random.normal(k_w, (H, D), dtype=jnp.float32) * 0.1       # deterministic params
    b = jax.random.normal(k_b, (D,), dtype=jnp.float32) * 0.01
    secondary = jax.random.normal(k_sec, (B, D), dtype=jnp.float32)   # precomputed claim embedding

    out = sts_explain_forward(x, w, b, secondary, seq_tile=16)
    out = jax.block_until_ready(out)

    # Pure-JAX reference with the ORIGINAL order (project each token, then mean)
    # and PyTorch's exact eps semantics, validating the pool-before-project refactor.
    primary_ref = jnp.mean(jnp.einsum("bsh,hd->bsd", x, w) + b, axis=1)
    eps = 1e-8
    dot = jnp.sum(primary_ref * secondary, axis=-1)
    p_sq = jnp.sum(primary_ref * primary_ref, axis=-1)
    s_sq = jnp.sum(secondary * secondary, axis=-1)
    ref = dot / jnp.sqrt(jnp.maximum(p_sq * s_sq, eps * eps))

    assert out.shape == (B,)
    assert jnp.allclose(out, ref, atol=1e-5, rtol=1e-5), (out, ref)

    # bf16 streaming path (halves HBM traffic; accumulation stays f32 in-kernel).
    x_bf16 = x.astype(jnp.bfloat16)
    out_bf16 = jax.block_until_ready(
        sts_explain_forward(x_bf16, w, b, secondary, seq_tile=16))
    assert out_bf16.shape == (B,)
    assert jnp.allclose(out_bf16, ref, atol=5e-2, rtol=5e-2), (out_bf16, ref)

    print("KERNEL_OK")
</pallas_src>

<mosaic_0001>
module attributes {stable_mosaic.version = 11 : i64} {
  func.func @_sts_kernel(%arg0: i32, %arg1: i32, %arg2: memref<2x16x128xf32, #tpu.memory_space<vmem>>, %arg3: memref<128x128xf32, #tpu.memory_space<vmem>>, %arg4: memref<1x128xf32, #tpu.memory_space<vmem>>, %arg5: memref<2x128xf32, #tpu.memory_space<vmem>>, %arg6: memref<2x128xf32, #tpu.memory_space<vmem>>, %arg7: memref<2x128xf32, #tpu.memory_space<vmem>>) attributes {dimension_semantics = [#tpu.dimension_semantics<parallel>, #tpu.dimension_semantics<arbitrary>], iteration_bounds = array<i64: 1, 4>, scalar_prefetch = 0 : i64, scratch_operands = 1 : i64, tpu.core_type = #tpu.core_type<tc>, window_params = [{transform_indices = @transform_0, window_bounds = array<i64: 2, 16, 128>}, {pipeline_mode = #tpu.pipeline_mode<synchronous>, transform_indices = @transform_1, window_bounds = array<i64: 128, 128>}, {pipeline_mode = #tpu.pipeline_mode<synchronous>, transform_indices = @transform_2, window_bounds = array<i64: 1, 128>}, {transform_indices = @transform_3, window_bounds = array<i64: 2, 128>}, {transform_indices = @transform_4, window_bounds = array<i64: 2, 128>}]} {
    %c0_i32 = arith.constant 0 : i32
    %0 = arith.cmpi eq, %arg1, %c0_i32 : i32
    %1 = arith.extui %0 : i1 to i32
    %c0_i32_0 = arith.constant 0 : i32
    %2 = arith.cmpi ne, %1, %c0_i32_0 : i32
    scf.if %2 {
      %cst_8 = arith.constant 0.000000e+00 : f32
      %11 = vector.broadcast %cst_8 : f32 to vector<2x128xf32>
      %c0_9 = arith.constant 0 : index
      %c0_10 = arith.constant 0 : index
      %12 = vector.load %arg7[%c0_9, %c0_10] : memref<2x128xf32, #tpu.memory_space<vmem>>, vector<2x128xf32>
      tpu.vector_store %arg7[%c0_9, %c0_10], %11 {strides = array<i32>} : memref<2x128xf32, #tpu.memory_space<vmem>>, vector<2x128xf32>,
    } else {
    }
    %c0 = arith.constant 0 : index
    %c0_1 = arith.constant 0 : index
    %3 = vector.load %arg7[%c0, %c0_1] : memref<2x128xf32, #tpu.memory_space<vmem>>, vector<2x128xf32>
    %c0_2 = arith.constant 0 : index
    %c0_3 = arith.constant 0 : index
    %c0_4 = arith.constant 0 : index
    %4 = vector.load %arg2[%c0_2, %c0_3, %c0_4] : memref<2x16x128xf32, #tpu.memory_space<vmem>>, vector<2x16x128xf32>
    %cst = arith.constant dense<0.000000e+00> : vector<2x128xf32>
    %5 = vector.multi_reduction <add>, %4, %cst [1] : vector<2x16x128xf32> to vector<2x128xf32>
    %6 = arith.addf %3, %5 : vector<2x128xf32>
    %c0_5 = arith.constant 0 : index
    %c0_6 = arith.constant 0 : index
    %7 = vector.load %arg7[%c0_5, %c0_6] : memref<2x128xf32, #tpu.memory_space<vmem>>, vector<2x128xf32>
    tpu.vector_store %arg7[%c0_5, %c0_6], %6 {strides = array<i32>} : memref<2x128xf32, #tpu.memory_space<vmem>>, vector<2x128xf32>,
    %c3_i32 = arith.constant 3 : i32
    %8 = arith.cmpi eq, %arg1, %c3_i32 : i32
    %9 = arith.extui %8 : i1 to i32
    %c0_i32_7 = arith.constant 0 : i32
    %10 = arith.cmpi ne, %9, %c0_i32_7 : i32
    scf.if %10 {
      %c0_8 = arith.constant 0 : index
      %c0_9 = arith.constant 0 : index
      %11 = vector.load %arg7[%c0_8, %c0_9] : memref<2x128xf32, #tpu.memory_space<vmem>>, vector<2x128xf32>
      %cst_10 = arith.constant 1.562500e-02 : f32
      %12 = vector.broadcast %cst_10 : f32 to vector<2x128xf32>
      %13 = arith.mulf %11, %12 : vector<2x128xf32>
      %c0_11 = arith.constant 0 : index
      %c0_12 = arith.constant 0 : index
      %14 = vector.load %arg3[%c0_11, %c0_12] : memref<128x128xf32, #tpu.memory_space<vmem>>, vector<128x128xf32>
      %c0_13 = arith.constant 0 : index
      %c0_14 = arith.constant 0 : index
      %15 = vector.load %arg4[%c0_13, %c0_14] : memref<1x128xf32, #tpu.memory_space<vmem>>, vector<1x128xf32>
      %cst_15 = arith.constant dense<0.000000e+00> : vector<2x128xf32>
      %16 = tpu.matmul %13, %14, %cst_15 {dimension_numbers = #tpu.dot_dimension_numbers<[1], [0], [0], [1], [0, 0, 1, 1], [], []>} : vector<2x128xf32>, vector<128x128xf32>, vector<2x128xf32> -> vector<2x128xf32>
      %17 = vector.broadcast %15 : vector<1x128xf32> to vector<2x128xf32>
      %18 = arith.addf %16, %17 : vector<2x128xf32>
      %c0_16 = arith.constant 0 : index
      %c0_17 = arith.constant 0 : index
      %19 = vector.load %arg5[%c0_16, %c0_17] : memref<2x128xf32, #tpu.memory_space<vmem>>, vector<2x128xf32>
      %20 = arith.mulf %18, %19 : vector<2x128xf32>
      %cst_18 = arith.constant dense<0.000000e+00> : vector<2xf32>
      %21 = vector.multi_reduction <add>, %20, %cst_18 [1] : vector<2x128xf32> to vector<2xf32>
      %22 = vector.shape_cast %21 : vector<2xf32> to vector<2x1xf32>
      %23 = arith.mulf %18, %18 : vector<2x128xf32>
      %cst_19 = arith.constant dense<0.000000e+00> : vector<2xf32>
      %24 = vector.multi_reduction <add>, %23, %cst_19 [1] : vector<2x128xf32> to vector<2xf32>
      %25 = vector.shape_cast %24 : vector<2xf32> to vector<2x1xf32>
      %26 = arith.mulf %19, %19 : vector<2x128xf32>
      %cst_20 = arith.constant dense<0.000000e+00> : vector<2xf32>
      %27 = vector.multi_reduction <add>, %26, %cst_20 [1] : vector<2x128xf32> to vector<2xf32>
      %28 = vector.shape_cast %27 : vector<2xf32> to vector<2x1xf32>
      %29 = arith.mulf %25, %28 : vector<2x1xf32>
      %cst_21 = arith.constant 9.99999993E-9 : f32
      %cst_22 = arith.constant 9.99999993E-9 : f32
      %30 = arith.mulf %cst_21, %cst_22 : f32
      %31 = vector.broadcast %30 : f32 to vector<2x1xf32>
      %32 = arith.maximumf %29, %31 : vector<2x1xf32>
      %33 = math.rsqrt %32 : vector<2x1xf32>
      %34 = arith.mulf %22, %33 : vector<2x1xf32>
      %35 = vector.shape_cast %34 : vector<2x1xf32> to vector<2x1xf32>
      %36 = vector.broadcast %35 : vector<2x1xf32> to vector<2x128xf32>
      %c0_23 = arith.constant 0 : index
      %c0_24 = arith.constant 0 : index
      %37 = vector.load %arg6[%c0_23, %c0_24] : memref<2x128xf32, #tpu.memory_space<vmem>>, vector<2x128xf32>
      tpu.vector_store %arg6[%c0_23, %c0_24], %36 {strides = array<i32>} : memref<2x128xf32, #tpu.memory_space<vmem>>, vector<2x128xf32>,
    } else {
    }
    return
  }
  func.func @transform_0(%arg0: i32, %arg1: i32) -> (i32, i32, i32) {
    %c0_i32 = arith.constant 0 : i32
    %c0_i32_0 = arith.constant 0 : i32
    return %arg0, %arg1, %c0_i32 : i32, i32, i32
  }
  func.func @transform_1(%arg0: i32, %arg1: i32) -> (i32, i32) {
    %c0_i32 = arith.constant 0 : i32
    %c0_i32_0 = arith.constant 0 : i32
    %c0_i32_1 = arith.constant 0 : i32
    return %c0_i32, %c0_i32_0 : i32, i32
  }
  func.func @transform_2(%arg0: i32, %arg1: i32) -> (i32, i32) {
    %c0_i32 = arith.constant 0 : i32
    %c0_i32_0 = arith.constant 0 : i32
    %c0_i32_1 = arith.constant 0 : i32
    return %c0_i32, %c0_i32_0 : i32, i32
  }
  func.func @transform_3(%arg0: i32, %arg1: i32) -> (i32, i32) {
    %c0_i32 = arith.constant 0 : i32
    %c0_i32_0 = arith.constant 0 : i32
    return %arg0, %c0_i32 : i32, i32
  }
  func.func @transform_4(%arg0: i32, %arg1: i32) -> (i32, i32) {
    %c0_i32 = arith.constant 0 : i32
    %c0_i32_0 = arith.constant 0 : i32
    return %arg0, %c0_i32 : i32, i32
  }
}

module attributes {stable_mosaic.version = 11 : i64} {
  func.func @_sts_kernel(%arg0: i32, %arg1: i32, %arg2: memref<2x16x128xf32, #tpu.memory_space<vmem>>, %arg3: memref<128x128xf32, #tpu.memory_space<vmem>>, %arg4: memref<1x128xf32, #tpu.memory_space<vmem>>, %arg5: memref<2x128xf32, #tpu.memory_space<vmem>>, %arg6: memref<2x128xf32, #tpu.memory_space<vmem>>, %arg7: memref<2x128xf32, #tpu.memory_space<vmem>>) attributes {dimension_semantics = [#tpu.dimension_semantics<parallel>, #tpu.dimension_semantics<arbitrary>], iteration_bounds = array<i64: 1, 4>, scalar_prefetch = 0 : i64, scratch_operands = 1 : i64, tpu.core_type = #tpu.core_type<tc>, window_params = [{transform_indices = @transform_0, window_bounds = array<i64: 2, 16, 128>}, {pipeline_mode = #tpu.pipeline_mode<synchronous>, transform_indices = @transform_1, window_bounds = array<i64: 128, 128>}, {pipeline_mode = #tpu.pipeline_mode<synchronous>, transform_indices = @transform_2, window_bounds = array<i64: 1, 128>}, {transform_indices = @transform_3, window_bounds = array<i64: 2, 128>}, {transform_indices = @transform_4, window_bounds = array<i64: 2, 128>}]} {
    %c0_i32 = arith.constant 0 : i32
    %0 = arith.cmpi eq, %arg1, %c0_i32 : i32
    %1 = arith.extui %0 : i1 to i32
    %c0_i32_0 = arith.constant 0 : i32
    %2 = arith.cmpi ne, %1, %c0_i32_0 : i32
    scf.if %2 {
      %cst_8 = arith.constant 0.000000e+00 : f32
      %11 = vector.broadcast %cst_8 : f32 to vector<2x128xf32>
      %c0_9 = arith.constant 0 : index
      %c0_10 = arith.constant 0 : index
      %12 = vector.load %arg7[%c0_9, %c0_10] : memref<2x128xf32, #tpu.memory_space<vmem>>, vector<2x128xf32>
      tpu.vector_store %arg7[%c0_9, %c0_10], %11 {strides = array<i32>} : memref<2x128xf32, #tpu.memory_space<vmem>>, vector<2x128xf32>,
    } else {
    }
    %c0 = arith.constant 0 : index
    %c0_1 = arith.constant 0 : index
    %3 = vector.load %arg7[%c0, %c0_1] : memref<2x128xf32, #tpu.memory_space<vmem>>, vector<2x128xf32>
    %c0_2 = arith.constant 0 : index
    %c0_3 = arith.constant 0 : index
    %c0_4 = arith.constant 0 : index
    %4 = vector.load %arg2[%c0_2, %c0_3, %c0_4] : memref<2x16x128xf32, #tpu.memory_space<vmem>>, vector<2x16x128xf32>
    %cst = arith.constant dense<0.000000e+00> : vector<2x128xf32>
    %5 = vector.multi_reduction <add>, %4, %cst [1] : vector<2x16x128xf32> to vector<2x128xf32>
    %6 = arith.addf %3, %5 : vector<2x128xf32>
    %c0_5 = arith.constant 0 : index
    %c0_6 = arith.constant 0 : index
    %7 = vector.load %arg7[%c0_5, %c0_6] : memref<2x128xf32, #tpu.memory_space<vmem>>, vector<2x128xf32>
    tpu.vector_store %arg7[%c0_5, %c0_6], %6 {strides = array<i32>} : memref<2x128xf32, #tpu.memory_space<vmem>>, vector<2x128xf32>,
    %c3_i32 = arith.constant 3 : i32
    %8 = arith.cmpi eq, %arg1, %c3_i32 : i32
    %9 = arith.extui %8 : i1 to i32
    %c0_i32_7 = arith.constant 0 : i32
    %10 = arith.cmpi ne, %9, %c0_i32_7 : i32
    scf.if %10 {
      %c0_8 = arith.constant 0 : index
      %c0_9 = arith.constant 0 : index
      %11 = vector.load %arg7[%c0_8, %c0_9] : memref<2x128xf32, #tpu.memory_space<vmem>>, vector<2x128xf32>
      %cst_10 = arith.constant 1.562500e-02 : f32
      %12 = vector.broadcast %cst_10 : f32 to vector<2x128xf32>
      %13 = arith.mulf %11, %12 : vector<2x128xf32>
      %c0_11 = arith.constant 0 : index
      %c0_12 = arith.constant 0 : index
      %14 = vector.load %arg3[%c0_11, %c0_12] : memref<128x128xf32, #tpu.memory_space<vmem>>, vector<128x128xf32>
      %c0_13 = arith.constant 0 : index
      %c0_14 = arith.constant 0 : index
      %15 = vector.load %arg4[%c0_13, %c0_14] : memref<1x128xf32, #tpu.memory_space<vmem>>, vector<1x128xf32>
      %cst_15 = arith.constant dense<0.000000e+00> : vector<2x128xf32>
      %16 = tpu.matmul %13, %14, %cst_15 {dimension_numbers = #tpu.dot_dimension_numbers<[1], [0], [0], [1], [0, 0, 1, 1], [], []>} : vector<2x128xf32>, vector<128x128xf32>, vector<2x128xf32> -> vector<2x128xf32>
      %17 = vector.broadcast %15 : vector<1x128xf32> to vector<2x128xf32>
      %18 = arith.addf %16, %17 : vector<2x128xf32>
      %c0_16 = arith.constant 0 : index
      %c0_17 = arith.constant 0 : index
      %19 = vector.load %arg5[%c0_16, %c0_17] : memref<2x128xf32, #tpu.memory_space<vmem>>, vector<2x128xf32>
      %20 = arith.mulf %18, %19 : vector<2x128xf32>
      %cst_18 = arith.constant dense<0.000000e+00> : vector<2xf32>
      %21 = vector.multi_reduction <add>, %20, %cst_18 [1] : vector<2x128xf32> to vector<2xf32>
      %22 = vector.shape_cast %21 : vector<2xf32> to vector<2x1xf32>
      %23 = arith.mulf %18, %18 : vector<2x128xf32>
      %cst_19 = arith.constant dense<0.000000e+00> : vector<2xf32>
      %24 = vector.multi_reduction <add>, %23, %cst_19 [1] : vector<2x128xf32> to vector<2xf32>
      %25 = vector.shape_cast %24 : vector<2xf32> to vector<2x1xf32>
      %26 = arith.mulf %19, %19 : vector<2x128xf32>
      %cst_20 = arith.constant dense<0.000000e+00> : vector<2xf32>
      %27 = vector.multi_reduction <add>, %26, %cst_20 [1] : vector<2x128xf32> to vector<2xf32>
      %28 = vector.shape_cast %27 : vector<2xf32> to vector<2x1xf32>
      %29 = arith.mulf %25, %28 : vector<2x1xf32>
      %cst_21 = arith.constant 9.99999993E-9 : f32
      %cst_22 = arith.constant 9.99999993E-9 : f32
      %30 = arith.mulf %cst_21, %cst_22 : f32
      %31 = vector.broadcast %30 : f32 to vector<2x1xf32>
      %32 = arith.maximumf %29, %31 : vector<2x1xf32>
      %33 = math.rsqrt %32 : vector<2x1xf32>
      %34 = arith.mulf %22, %33 : vector<2x1xf32>
      %35 = vector.shape_cast %34 : vector<2x1xf32> to vector<2x1xf32>
      %36 = vector.broadcast %35 : vector<2x1xf32> to vector<2x128xf32>
      %c0_23 = arith.constant 0 : index
      %c0_24 = arith.constant 0 : index
      %37 = vector.load %arg6[%c0_23, %c0_24] : memref<2x128xf32, #tpu.memory_space<vmem>>, vector<2x128xf32>
      tpu.vector_store %arg6[%c0_23, %c0_24], %36 {strides = array<i32>} : memref<2x128xf32, #tpu.memory_space<vmem>>, vector<2x128xf32>,
    } else {
    }
    return
  }
  func.func @transform_0(%arg0: i32, %arg1: i32) -> (i32, i32, i32) {
    %c0_i32 = arith.constant 0 : i32
    %c0_i32_0 = arith.constant 0 : i32
    return %arg0, %arg1, %c0_i32 : i32, i32, i32
  }
  func.func @transform_1(%arg0: i32, %arg1: i32) -> (i32, i32) {
    %c0_i32 = arith.constant 0 : i32
    %c0_i32_0 = arith.constant 0 : i32
    %c0_i32_1 = arith.constant 0 : i32
    return %c0_i32, %c0_i32_0 : i32, i32
  }
  func.func @transform_2(%arg0: i32, %arg1: i32) -> (i32, i32) {
    %c0_i32 = arith.constant 0 : i32
    %c0_i32_0 = arith.constant 0 : i32
    %c0_i32_1 = arith.constant 0 : i32
    return %c0_i32, %c0_i32_0 : i32, i32
  }
  func.func @transform_3(%arg0: i32, %arg1: i32) -> (i32, i32) {
    %c0_i32 = arith.constant 0 : i32
    %c0_i32_0 = arith.constant 0 : i32
    return %arg0, %c0_i32 : i32, i32
  }
  func.func @transform_4(%arg0: i32, %arg1: i32) -> (i32, i32) {
    %c0_i32 = arith.constant 0 : i32
    %c0_i32_0 = arith.constant 0 : i32
    return %arg0, %c0_i32 : i32, i32
  }
}

</mosaic_0001>

<bundles_post_ra>
// kernel: tpu_custom_call.1
= control target key start
LH: loop header
LB: loop body
LE: loop exit
PB: predicated region body
PF: predicated region fallthrough
CT: control target
= control target key end

     0   :  { %9 = vsyncpa [#allocation4], 0  ;;  %s988_s0 = inlined_call_operand.hbm [shape: f32[2,64,128], index: 0, kind: input, shape index: {}]   ;;  %s989_s1 = inlined_call_operand.hbm [shape: f32[128,128], index: 1, kind: input, shape index: {}]   ;;  %s990_s2 = inlined_call_operand.vmem [shape: f32[1,128], index: 2, kind: input, shape index: {}]   ;;  %s991_s3 = inlined_call_operand.vmem [shape: f32[2,128], index: 3, kind: input, shape index: {}]   ;;  %s992_s4 = inlined_call_operand.hbm [shape: f32[2,128], index: 4, kind: output, shape index: {}]  }
   0x1   :  { %11 = vsyncpa [#allocation4 + $0x1], 0 }
   0x2   :  { %12 = vsyncpa [#allocation7], 0 }
   0x3   :  { %13 = vsyncpa [#allocation5], 0  ;;  %s841_s15 = smov 0   ;;  %s843_s16 = smov 0  }
   0x4   :  { %s845_s17 = smov 0   ;;  %s847_s18 = smov 0  }
   0x5   :  { %s849_s19 = smov 0   ;;  %s851_s20 = smov 0  }
   0x6 LB: > { %s532_s21 = sadd.s32 4294967295, %s801_s20   ;;  %s28_s22 = sadd.s32 1, %s797_s19  ;;  %s801_s20 = sphi %s851_s20, %s19_s20   ;;  %s797_s19 = sphi %s849_s19, %s1004_s19   ;;  %s793_s18 = sphi %s847_s18, %s1003_s18   ;;  %s789_s17 = sphi %s845_s17, %s1002_s17   ;;  %s785_s16 = sphi %s843_s16, %s1001_s16   ;;  %s781_s15 = sphi %s841_s15, %s1000_s15  }
   0x7   : > { %p29_p0 = scmp.ge.s32.totalorder %s28_s22, 4  ;;  %s40_s23 = sadd.s32 1, %s789_s17 }
   0x8   : > { %p47_p1 = scmp.ne.s32.totalorder %s789_s17, %s785_s16  ;;  %p48_p2 = scmp.eq.s32.totalorder %s801_s20, 0 }
   0x9   : > { %s1006_s22 = smov (%p29_p0, %s28_s22), 0  ;;  %p53_p4 = scmp.ne.s32.totalorder %s785_s16, %s781_s15 }
   0xa   : > { %p877_p3 = por %p48_p2, %p47_p1  ;;  %s36_s25 = ssub.s32 %s797_s19, %s1006_s22 }
   0xb   : > { %p886_p5 = scmp.eq.s32.totalorder %s532_s21, 0  ;;  %p38_p6 = scmp.eq.s32.totalorder %s36_s25, 0 }
   0xc   : > { %p533_p7 = scmp.ge.s32.totalorder %s801_s20, 1  ;;  %p158_p9 = scmp.lt.s32.totalorder %s801_s20, 5 }
   0xd   : > { %p893_p8 = por %p886_p5, %p53_p4  ;;  %s803_s30 = smov [#allocation6]  }
   0xe   : > { %s899_s28 = scalar_select %p38_p6, %s789_s17, %s40_s23  }
   0xf   : > { %s996_s27 = scalar_select %p893_p8, 1, 0 }
  0x10   : > { %p901_p10 = pnand %p533_p7, %p158_p9  ;;  %s170_s5 = sshll.u32 %s803_s30, 4  ;;  %s171_s5 = int_to_ptr.vmem [resolvable:$true] %s170_s5 }
  0x11   : > { %s704_s6 = scalar_lea.vmem %s171_s5, 2048  ;;  %p712_p4 = scmp.lt.s32.totalorder %s171_s5, %s171_s5 }
  0x12   : > { %p622_p11 = pneg %p901_p10  ;;  %p705_p0 = scmp.ne.s32.totalorder %s171_s5, %s704_s6 }
  0x13   : > { %p713_p6 = scmp.lt.s32.totalorder %s704_s6, %s704_s6 }
  0x14   : > { %p623_p12 = pnand %p622_p11, %p886_p5 }
  0x15   : > { %p714_p8 = por %p713_p6, %p712_p4 }
  0x16   : > { %p695_p13 = pneg %p623_p12 }
  0x18   : > { %p707_p1 = pnand %p705_p0, %p695_p13 }
  0x1a   : > { %p708_p2 = pneg %p707_p1 }
  0x1c   : > { %p715_p7 = pnand %p714_p8, %p708_p2 }
  0x1e   : > { %718 = shalt.err (!%p715_p7)
}
  0x1f   : > { %s804_s7 = smov 128   ;;  %s805_s8 = smov 8  }
  0x20   : > { %625 = dma.hbm_to_vmem [thread:$0]  (!%p623_p12), %s989_s1, 2048, %s171_s5, [#allocation7], %s804_s7, %s804_s7, %s805_s8  }
  0x21   : > { %p536_p9 = scmp.ge.s32.totalorder %s801_s20, 4 }
  0x23   : > { %190 = sbr.rel (%p536_p9) target bundleno = 53 (0x35), region = 28 }
  0x28   : > { %s194_s11 = sand.u32 1, %s789_s17   ;;  %s552_s12 = sshll.u32 %s797_s19, 8 }
  0x29   : > { %s537_s13 = sshll.u32 %s194_s11, 5  ;;  %s207_s23 = scalar_lea.hbm %s988_s0, %s552_s12 }
  0x2a   : > { %s607_s25 = scalar_select %p877_p3, [#allocation0], [#allocation11] }
  0x2b   : > { %s198_s30 = scalar_lea.vmem [#allocation3], %s537_s13  ;;  %s806_s7 = smov 1024  }
  0x2c   : > { %s220_s5 = sshll.u32 %s198_s30, 4  ;;  %s212_s6 = sld [smem:[%s607_s25]]   ;;  %s221_s5 = int_to_ptr.vmem [resolvable:$true] %s220_s5 }
  0x2d   : > { %608 = sst [smem:[#allocation10]] (%p877_p3), %s806_s7  ;;  %s807_s8 = smov 256  }
  0x2e   : > { %609 = sst [smem:[#allocation10 + $0x1]] (%p877_p3), %s807_s8  ;;  %s808_s9 = smov 2  }
  0x2f   : > { %610 = sst [smem:[#allocation10 + $0x2]] (%p877_p3), %s808_s9  ;;  %s809_s10 = smov 128  }
  0x30   : > { %611 = sst [smem:[#allocation10 + $0x3]] (%p877_p3), %s809_s10  ;;  %s810_s13 = smov 8  }
  0x31   : > { %612 = sst [smem:[#allocation10 + $0x4]] (%p877_p3), %s809_s10  ;;  %s195_s15 = scalar_lea.sflag [#allocation4], %s194_s11 }
  0x32   : > { %s540_s12 = sshll.u32 %s212_s6, 26  ;;  %613 = sst [smem:[#allocation10 + $0x5]] (%p877_p3), %s810_s13 }
  0x33   : > { %s541_s14 = sadd.s32 134217728, %s540_s12  ;;  %s811_s25 = smov 131072  }
  0x34   : > { %614 = dma.general (%p877_p3), %s207_s23, 512, %s221_s5, %s195_s15, %s811_s25, [#allocation10], %s541_s14, 0  }
  0x35 PF: > { %245 = sbr.rel (%p901_p10) target bundleno = 499 (0x1f3), region = 36  ;;  %s247_s30 = sand.u32 (!%p901_p10), 1, %s785_s16  }
  0x36   : > { %s543_s7 = sshll.u32 (!%p901_p10), %s247_s30, 5  ;;  %s248_s8 = scalar_lea.sflag (!%p901_p10), [#allocation4], %s247_s30 }
  0x37   : > { %s251_s9 = scalar_lea.vmem (!%p901_p10), [#allocation3], %s543_s7  ;;  %p998_p8 = scmp.ne.s32.totalorder (!%p901_p10), %s996_s27, 0 }
  0x3a   : > { %768 = dma.done.wait (%p998_p8), %s248_s8, 512  }
  0x3b   : > { %770 = vsyncadd (%p998_p8), %s248_s8, 4294966784 }
  0x3c   : > { %772 = dma.done.wait (%p886_p5), [#allocation7], 2048  }
  0x3d   : > { %774 = vsyncadd (%p886_p5), [#allocation7], 4294965248  ;;  %p545_p3 = scmp.ne.s32.totalorder %s793_s18, 0 }
  0x3f   : > { %288 = sbr.rel (%p545_p3) target bundleno = 70 (0x46), region = 48 }
  0x44   : > { %v812_v0 = vmov 0.0  }
  0x45   : > { %289 = vst [vmem:[#allocation2] sm:$0x3] %v812_v0 }
  0x46 PF: > { %v291_v1 = vld [vmem:[%s251_s9] sm:$0xff]  ;;  %v292_v2 = vld [vmem:[%s251_s9 + $0x8] sm:$0xff]  ;;  %v293_v3 = vld [vmem:[%s251_s9 + $0x10] sm:$0xff]  ;;  %vm311_vm0 = vcmask 1041409   ;;  %p546_p5 = scmp.ne.s32.totalorder %s793_s18, 3 }
  0x47   : > { %v294_v4 = vld [vmem:[%s251_s9 + $0x18] sm:$0xff]  ;;  %v295_v5 = vadd.f32 %v292_v2, %v291_v1 }
  0x48   : > { %v302_v6 = vadd.f32 %v294_v4, %v293_v3 }
  0x49   : > { %v296_v7 = vrot.slane %v295_v5, 4 }
  0x4a   : > { %v303_v8 = vrot.slane %v302_v6, 4 }
  0x4b   : > { %v297_v9 = vadd.f32 %v296_v7, %v295_v5 }
  0x4c   : > { %v304_v10 = vadd.f32 %v303_v8, %v302_v6  ;;  %v290_v18 = vld [vmem:[#allocation2] sm:$0x3] }
  0x4d   : > { %v298_v11 = vrot.slane %v297_v9, 2 }
  0x4e   : > { %v305_v12 = vrot.slane %v304_v10, 2 }
  0x4f   : > { %v299_v13 = vadd.f32 %v298_v11, %v297_v9 }
  0x50   : > { %v306_v14 = vadd.f32 %v305_v12, %v304_v10 }
  0x51   : > { %v300_v15 = vrot.slane %v299_v13, 1 }
  0x52   : > { %v307_v16 = vrot.slane %v306_v14, 1 }
  0x53   : > { %v301_v17 = vadd.f32 %v300_v15, %v299_v13 }
  0x54   : > { %v308_v19 = vadd.f32 %v307_v16, %v306_v14 }
  0x55   : > { %319 = sbr.rel (%p546_p5) target bundleno = 484 (0x1e4), region = 52 }
  0x56   : > { %v312_v20 = vsel %vm311_vm0, %v308_v19, %v301_v17 }
  0x57   : > { %v314_v21 = vadd.f32 %v312_v20, %v290_v18 }
  0x59   : > { %315 = vst [vmem:[#allocation2] sm:$0x3] %v314_v21 }
  0x5a   : > { %v337_v22 = vld [vmem:[#allocation6 + $0x78] sm:$0xff]  ;;  %v813_v23 = vmov 0.0   ;;  %v336_v24 = vld [vmem:[#allocation6 + $0x70] sm:$0xff]  ;;  %vm814_vm1 = vmmov 0   ;;  %v335_v25 = vld [vmem:[#allocation6 + $0x68] sm:$0xff]  ;;  %vm417_vm2 = vcmask 1041408  }
  0x5b   : > { %570 = vmatprep.subr.mxu0 %v813_v23  ;;  %602 = vmatprep.mubr.msk.f32.mxu0 %vm814_vm1, %v813_v23  ;;  %v334_v26 = vld [vmem:[#allocation6 + $0x60] sm:$0xff]  ;;  %v333_v27 = vld [vmem:[#allocation6 + $0x58] sm:$0xff]  ;;  %v332_v28 = vld [vmem:[#allocation6 + $0x50] sm:$0xff] }
  0x5c   : > { %571 = vmatpush3.msra.mxu0 %v337_v22  ;;  %v331_v29 = vld [vmem:[#allocation6 + $0x48] sm:$0xff]  ;;  %v330_v30 = vld [vmem:[#allocation6 + $0x40] sm:$0xff]  ;;  %v329_v31 = vld [vmem:[#allocation6 + $0x38] sm:$0xff] }
  0x5d   : > { %572 = vmatprep.subr.mxu0 %v813_v23  ;;  %v328_v32 = vld [vmem:[#allocation6 + $0x30] sm:$0xff]  ;;  %v327_v33 = vld [vmem:[#allocation6 + $0x28] sm:$0xff]  ;;  %v326_v34 = vld [vmem:[#allocation6 + $0x20] sm:$0xff] }
  0x5e   : > { %573 = vmatpush3.msra.mxu0 %v336_v24  ;;  %v325_v35 = vld [vmem:[#allocation6 + $0x18] sm:$0xff]  ;;  %v324_v36 = vld [vmem:[#allocation6 + $0x10] sm:$0xff]  ;;  %v323_v38 = vld [vmem:[#allocation6 + $0x8] sm:$0xff] }
  0x5f   : > { %574 = vmatprep.subr.mxu0 %v813_v23  ;;  %v322_v39 = vld [vmem:[#allocation6] sm:$0xff]  ;;  %v547_v41 = vld [vmem:[%s990_s2] ss:$0 sm:$0xff] }
  0x60   : > { %575 = vmatpush3.msra.mxu0 %v335_v25  ;;  %v320_v37 = vld [vmem:[#allocation2] sm:$0x3] }
  0x61   : > { %576 = vmatprep.subr.mxu0 %v813_v23  ;;  %v321_v40 = vmul.f32 0.015625, %v320_v37  ;;  %v415_v43 = vld [vmem:[%s991_s3] sm:$0x3] }
  0x62   : > { %577 = vmatpush3.msra.mxu0 %v334_v26  ;;  %v425_v48 = vmul.f32 %v415_v43, %v415_v43 }
  0x63   : > { %578 = vmatprep.subr.mxu0 %v813_v23 }
  0x64   : > { %579 = vmatpush3.msra.mxu0 %v333_v27  ;;  %v426_v51 = vsel %vm417_vm2, %v425_v48, 0.0 }
  0x65   : > { %580 = vmatprep.subr.mxu0 %v813_v23 }
  0x66   : > { %581 = vmatpush3.msra.mxu0 %v332_v28 }
  0x67   : > { %582 = vmatprep.subr.mxu0 %v813_v23 }
  0x68   : > { %583 = vmatpush3.msra.mxu0 %v331_v29 }
  0x69   : > { %584 = vmatprep.subr.mxu0 %v813_v23 }
  0x6a   : > { %585 = vmatpush3.msra.mxu0 %v330_v30 }
  0x6b   : > { %586 = vmatprep.subr.mxu0 %v813_v23 }
  0x6c   : > { %587 = vmatpush3.msra.mxu0 %v329_v31 }
  0x6d   : > { %588 = vmatprep.subr.mxu0 %v813_v23 }
  0x6e   : > { %589 = vmatpush3.msra.mxu0 %v328_v32 }
  0x6f   : > { %590 = vmatprep.subr.mxu0 %v813_v23 }
  0x70   : > { %591 = vmatpush3.msra.mxu0 %v327_v33 }
  0x71   : > { %592 = vmatprep.subr.mxu0 %v813_v23 }
  0x72   : > { %593 = vmatpush3.msra.mxu0 %v326_v34 }
  0x73   : > { %594 = vmatprep.subr.mxu0 %v813_v23 }
  0x74   : > { %595 = vmatpush3.msra.mxu0 %v325_v35 }
  0x75   : > { %596 = vmatprep.subr.mxu0 %v813_v23 }
  0x76   : > { %597 = vmatpush3.msra.mxu0 %v324_v36 }
  0x77   : > { %598 = vmatprep.subr.mxu0 %v813_v23 }
  0x78   : > { %599 = vmatpush3.msra.mxu0 %v323_v38 }
  0x79   : > { %600 = vmatprep.subr.mxu0 %v813_v23 }
  0x7a   : > { %601 = vmatpush3.msra.mxu0 %v322_v39 }
  0x7b   : > { %603 = vmatmul.mubr.f32.vlgmr.msra.gmra.mxu0 %v321_v40 }
 0x13b   : > { %v411_v42 = vpop.f32.mrf.mxu0 }
 0x13c   : > { %v412_v44 = vadd.f32 %v547_v41, %v411_v42 }
 0x13d   : > { %v604_v45 = vpop.f32.mrf.mxu0 }
 0x13e   : > { %v421_v46 = vmul.f32 %v412_v44, %v412_v44  ;;  %v416_v47 = vmul.f32 %v415_v43, %v412_v44 }
 0x140   : > { %v422_v49 = vsel %vm417_vm2, %v421_v46, 0.0  ;;  %v418_v50 = vsel %vm417_vm2, %v416_v47, 0.0 }
 0x141   : > { %423 = vadd.xlane.f32.xlu0 %v422_v49  ;;  %419 = vadd.xlane.f32.xlu1 %v418_v50 }
 0x145   : > { %427 = vadd.xlane.f32.xlu0 %v426_v51 }
 0x1ca   : > { %v424_v52 = vpop.xlane.xlu0 %423  ;;  %v420_v57 = vpop.xlane.xlu1 %419 }
 0x1ce   : > { %v428_v53 = vpop.xlane.xlu0 %427 }
 0x1cf   : > { %v429_v54 = vmul.f32 %v428_v53, %v424_v52 }
 0x1d1   : > { %v430_v55 = vmax.f32 %v429_v54, 1e-16 }
 0x1d3   : > { %691 = vrsqrt.f32 %v430_v55 }
 0x1e0   : > { %v692_v56 = vpop.eup %691 }
 0x1e1   : > { %v432_v58 = vmul.f32 %v692_v56, %v420_v57 }
 0x1e3   : > { %433 = vst [vmem:[#allocation8] sm:$0x3] %v432_v58 }
 0x1e4 PF: > { %p955_p10 = scmp.eq.s32.totalorder %s532_s21, 3  ;;  %s815_s11 = smov [#allocation8]  }
 0x1e5   : > { %s443_s23 = sshll.u32 %s815_s11, 4  ;;  %s444_s23 = int_to_ptr.vmem [resolvable:$true] %s443_s23 }
 0x1e6   : > { %s719_s5 = scalar_lea.vmem %s444_s23, 32  ;;  %p726_p0 = scmp.lt.s32.totalorder %s444_s23, %s444_s23 }
 0x1e7   : > { %p720_p11 = scmp.ne.s32.totalorder %s444_s23, %s719_s5  ;;  %p727_p1 = scmp.lt.s32.totalorder %s719_s5, %s719_s5 }
 0x1e9   : > { %p721_p12 = pnand %p720_p11, %p955_p10  ;;  %p728_p2 = por %p727_p1, %p726_p0 }
 0x1eb   : > { %p722_p13 = pneg %p721_p12 }
 0x1ed   : > { %p729_p4 = pnand %p728_p2, %p722_p13 }
 0x1ef   : > { %732 = shalt.err (!%p729_p4)
}
 0x1f0   : > { %619 = dma.vmem_to_hbm [thread:$0]  (%p955_p10), %s444_s23, 32, %s992_s4, [#allocation5]  }
 0x1f1   : > { %776 = dma.done.wait (%p955_p10), [#allocation5], 32  }
 0x1f2   : > { %778 = vsyncadd (%p955_p10), [#allocation5], 4294967264 }
 0x1f3 PF: > { %s19_s20 = sadd.s32 1, %s801_s20   ;;  %s1000_s15 = smov %s785_s16 }
 0x1f4   : > { %p16_p6 = scmp.ge.s32.totalorder %s19_s20, 6   ;;  %s1001_s16 = smov %s789_s17 }
 0x1f5   : > { %s1002_s17 = smov %s899_s28  ;;  %s1003_s18 = smov %s797_s19 }
 0x1f6   : > { %s1004_s19 = smov %s1006_s22  ;;  %18 = sbr.rel (!%p16_p6) target bundleno = 6 (0x6), region = 94 }
 0x1fb   :  { %456 = vsyncpa [#allocation4], 1 }
 0x1fc   :  { %458 = vsyncpa [#allocation4 + $0x1], 1 }
 0x1fd   :  { %459 = vsyncpa [#allocation7], 1 }
 0x1fe   :  { %460 = vsyncpa [#allocation5], 1 }
 0x1ff   :  { %462 = vsyncpa [#allocation5 + $0x1], 1 }

// kernel: tpu_custom_call.1
= control target key start
LH: loop header
LB: loop body
LE: loop exit
PB: predicated region body
PF: predicated region fallthrough
CT: control target
= control target key end

     0   :  { %9 = vsyncpa [#allocation4], 0  ;;  %s988_s0 = inlined_call_operand.hbm [shape: f32[2,64,128], index: 0, kind: input, shape index: {}]   ;;  %s989_s1 = inlined_call_operand.hbm [shape: f32[128,128], index: 1, kind: input, shape index: {}]   ;;  %s990_s2 = inlined_call_operand.vmem [shape: f32[1,128], index: 2, kind: input, shape index: {}]   ;;  %s991_s3 = inlined_call_operand.vmem [shape: f32[2,128], index: 3, kind: input, shape index: {}]   ;;  %s992_s4 = inlined_call_operand.hbm [shape: f32[2,128], index: 4, kind: output, shape index: {}]  }
   0x1   :  { %11 = vsyncpa [#allocation4 + $0x1], 0 }
   0x2   :  { %12 = vsyncpa [#allocation7], 0 }
   0x3   :  { %13 = vsyncpa [#allocation5], 0  ;;  %s841_s15 = smov 0   ;;  %s843_s16 = smov 0  }
   0x4   :  { %s845_s17 = smov 0   ;;  %s847_s18 = smov 0  }
   0x5   :  { %s849_s19 = smov 0   ;;  %s851_s20 = smov 0  }
   0x6 LB: > { %s532_s21 = sadd.s32 4294967295, %s801_s20   ;;  %s28_s22 = sadd.s32 1, %s797_s19  ;;  %s801_s20 = sphi %s851_s20, %s19_s20   ;;  %s797_s19 = sphi %s849_s19, %s1004_s19   ;;  %s793_s18 = sphi %s847_s18, %s1003_s18   ;;  %s789_s17 = sphi %s845_s17, %s1002_s17   ;;  %s785_s16 = sphi %s843_s16, %s1001_s16   ;;  %s781_s15 = sphi %s841_s15, %s1000_s15  }
   0x7   : > { %p29_p0 = scmp.ge.s32.totalorder %s28_s22, 4  ;;  %s40_s23 = sadd.s32 1, %s789_s17 }
   0x8   : > { %p47_p1 = scmp.ne.s32.totalorder %s789_s17, %s785_s16  ;;  %p48_p2 = scmp.eq.s32.totalorder %s801_s20, 0 }
   0x9   : > { %s1006_s22 = smov (%p29_p0, %s28_s22), 0  ;;  %p53_p4 = scmp.ne.s32.totalorder %s785_s16, %s781_s15 }
   0xa   : > { %p877_p3 = por %p48_p2, %p47_p1  ;;  %s36_s25 = ssub.s32 %s797_s19, %s1006_s22 }
   0xb   : > { %p886_p5 = scmp.eq.s32.totalorder %s532_s21, 0  ;;  %p38_p6 = scmp.eq.s32.totalorder %s36_s25, 0 }
   0xc   : > { %p533_p7 = scmp.ge.s32.totalorder %s801_s20, 1  ;;  %p158_p9 = scmp.lt.s32.totalorder %s801_s20, 5 }
   0xd   : > { %p893_p8 = por %p886_p5, %p53_p4  ;;  %s803_s30 = smov [#allocation6]  }
   0xe   : > { %s899_s28 = scalar_select %p38_p6, %s789_s17, %s40_s23  }
   0xf   : > { %s996_s27 = scalar_select %p893_p8, 1, 0 }
  0x10   : > { %p901_p10 = pnand %p533_p7, %p158_p9  ;;  %s170_s5 = sshll.u32 %s803_s30, 4  ;;  %s171_s5 = int_to_ptr.vmem [resolvable:$true] %s170_s5 }
  0x11   : > { %s704_s6 = scalar_lea.vmem %s171_s5, 2048  ;;  %p712_p4 = scmp.lt.s32.totalorder %s171_s5, %s171_s5 }
  0x12   : > { %p622_p11 = pneg %p901_p10  ;;  %p705_p0 = scmp.ne.s32.totalorder %s171_s5, %s704_s6 }
  0x13   : > { %p713_p6 = scmp.lt.s32.totalorder %s704_s6, %s704_s6 }
  0x14   : > { %p623_p12 = pnand %p622_p11, %p886_p5 }
  0x15   : > { %p714_p8 = por %p713_p6, %p712_p4 }
  0x16   : > { %p695_p13 = pneg %p623_p12 }
  0x18   : > { %p707_p1 = pnand %p705_p0, %p695_p13 }
  0x1a   : > { %p708_p2 = pneg %p707_p1 }
  0x1c   : > { %p715_p7 = pnand %p714_p8, %p708_p2 }
  0x1e   : > { %718 = shalt.err (!%p715_p7)
}
  0x1f   : > { %s804_s7 = smov 128   ;;  %s805_s8 = smov 8  }
  0x20   : > { %625 = dma.hbm_to_vmem [thread:$0]  (!%p623_p12), %s989_s1, 2048, %s171_s5, [#allocation7], %s804_s7, %s804_s7, %s805_s8  }
  0x21   : > { %p536_p9 = scmp.ge.s32.totalorder %s801_s20, 4 }
  0x23   : > { %190 = sbr.rel (%p536_p9) target bundleno = 53 (0x35), region = 28 }
  0x28   : > { %s194_s11 = sand.u32 1, %s789_s17   ;;  %s552_s12 = sshll.u32 %s797_s19, 8 }
  0x29   : > { %s537_s13 = sshll.u32 %s194_s11, 5  ;;  %s207_s23 = scalar_lea.hbm %s988_s0, %s552_s12 }
  0x2a   : > { %s607_s25 = scalar_select %p877_p3, [#allocation0], [#allocation11] }
  0x2b   : > { %s198_s30 = scalar_lea.vmem [#allocation3], %s537_s13  ;;  %s806_s7 = smov 1024  }
  0x2c   : > { %s220_s5 = sshll.u32 %s198_s30, 4  ;;  %s212_s6 = sld [smem:[%s607_s25]]   ;;  %s221_s5 = int_to_ptr.vmem [resolvable:$true] %s220_s5 }
  0x2d   : > { %608 = sst [smem:[#allocation10]] (%p877_p3), %s806_s7  ;;  %s807_s8 = smov 256  }
  0x2e   : > { %609 = sst [smem:[#allocation10 + $0x1]] (%p877_p3), %s807_s8  ;;  %s808_s9 = smov 2  }
  0x2f   : > { %610 = sst [smem:[#allocation10 + $0x2]] (%p877_p3), %s808_s9  ;;  %s809_s10 = smov 128  }
  0x30   : > { %611 = sst [smem:[#allocation10 + $0x3]] (%p877_p3), %s809_s10  ;;  %s810_s13 = smov 8  }
  0x31   : > { %612 = sst [smem:[#allocation10 + $0x4]] (%p877_p3), %s809_s10  ;;  %s195_s15 = scalar_lea.sflag [#allocation4], %s194_s11 }
  0x32   : > { %s540_s12 = sshll.u32 %s212_s6, 26  ;;  %613 = sst [smem:[#allocation10 + $0x5]] (%p877_p3), %s810_s13 }
  0x33   : > { %s541_s14 = sadd.s32 134217728, %s540_s12  ;;  %s811_s25 = smov 131072  }
  0x34   : > { %614 = dma.general (%p877_p3), %s207_s23, 512, %s221_s5, %s195_s15, %s811_s25, [#allocation10], %s541_s14, 0  }
  0x35 PF: > { %245 = sbr.rel (%p901_p10) target bundleno = 499 (0x1f3), region = 36  ;;  %s247_s30 = sand.u32 (!%p901_p10), 1, %s785_s16  }
  0x36   : > { %s543_s7 = sshll.u32 (!%p901_p10), %s247_s30, 5  ;;  %s248_s8 = scalar_lea.sflag (!%p901_p10), [#allocation4], %s247_s30 }
  0x37   : > { %s251_s9 = scalar_lea.vmem (!%p901_p10), [#allocation3], %s543_s7  ;;  %p998_p8 = scmp.ne.s32.totalorder (!%p901_p10), %s996_s27, 0 }
  0x3a   : > { %768 = dma.done.wait (%p998_p8), %s248_s8, 512  }
  0x3b   : > { %770 = vsyncadd (%p998_p8), %s248_s8, 4294966784 }
  0x3c   : > { %772 = dma.done.wait (%p886_p5), [#allocation7], 2048  }
  0x3d   : > { %774 = vsyncadd (%p886_p5), [#allocation7], 4294965248  ;;  %p545_p3 = scmp.ne.s32.totalorder %s793_s18, 0 }
  0x3f   : > { %288 = sbr.rel (%p545_p3) target bundleno = 70 (0x46), region = 48 }
  0x44   : > { %v812_v0 = vmov 0.0  }
  0x45   : > { %289 = vst [vmem:[#allocation2] sm:$0x3] %v812_v0 }
  0x46 PF: > { %v291_v1 = vld [vmem:[%s251_s9] sm:$0xff]  ;;  %v292_v2 = vld [vmem:[%s251_s9 + $0x8] sm:$0xff]  ;;  %v293_v3 = vld [vmem:[%s251_s9 + $0x10] sm:$0xff]  ;;  %vm311_vm0 = vcmask 1041409   ;;  %p546_p5 = scmp.ne.s32.totalorder %s793_s18, 3 }
  0x47   : > { %v294_v4 = vld [vmem:[%s251_s9 + $0x18] sm:$0xff]  ;;  %v295_v5 = vadd.f32 %v292_v2, %v291_v1 }
  0x48   : > { %v302_v6 = vadd.f32 %v294_v4, %v293_v3 }
  0x49   : > { %v296_v7 = vrot.slane %v295_v5, 4 }
  0x4a   : > { %v303_v8 = vrot.slane %v302_v6, 4 }
  0x4b   : > { %v297_v9 = vadd.f32 %v296_v7, %v295_v5 }
  0x4c   : > { %v304_v10 = vadd.f32 %v303_v8, %v302_v6  ;;  %v290_v18 = vld [vmem:[#allocation2] sm:$0x3] }
  0x4d   : > { %v298_v11 = vrot.slane %v297_v9, 2 }
  0x4e   : > { %v305_v12 = vrot.slane %v304_v10, 2 }
  0x4f   : > { %v299_v13 = vadd.f32 %v298_v11, %v297_v9 }
  0x50   : > { %v306_v14 = vadd.f32 %v305_v12, %v304_v10 }
  0x51   : > { %v300_v15 = vrot.slane %v299_v13, 1 }
  0x52   : > { %v307_v16 = vrot.slane %v306_v14, 1 }
  0x53   : > { %v301_v17 = vadd.f32 %v300_v15, %v299_v13 }
  0x54   : > { %v308_v19 = vadd.f32 %v307_v16, %v306_v14 }
  0x55   : > { %319 = sbr.rel (%p546_p5) target bundleno = 484 (0x1e4), region = 52 }
  0x56   : > { %v312_v20 = vsel %vm311_vm0, %v308_v19, %v301_v17 }
  0x57   : > { %v314_v21 = vadd.f32 %v312_v20, %v290_v18 }
  0x59   : > { %315 = vst [vmem:[#allocation2] sm:$0x3] %v314_v21 }
  0x5a   : > { %v337_v22 = vld [vmem:[#allocation6 + $0x78] sm:$0xff]  ;;  %v813_v23 = vmov 0.0   ;;  %v336_v24 = vld [vmem:[#allocation6 + $0x70] sm:$0xff]  ;;  %vm814_vm1 = vmmov 0   ;;  %v335_v25 = vld [vmem:[#allocation6 + $0x68] sm:$0xff]  ;;  %vm417_vm2 = vcmask 1041408  }
  0x5b   : > { %570 = vmatprep.subr.mxu0 %v813_v23  ;;  %602 = vmatprep.mubr.msk.f32.mxu0 %vm814_vm1, %v813_v23  ;;  %v334_v26 = vld [vmem:[#allocation6 + $0x60] sm:$0xff]  ;;  %v333_v27 = vld [vmem:[#allocation6 + $0x58] sm:$0xff]  ;;  %v332_v28 = vld [vmem:[#allocation6 + $0x50] sm:$0xff] }
  0x5c   : > { %571 = vmatpush3.msra.mxu0 %v337_v22  ;;  %v331_v29 = vld [vmem:[#allocation6 + $0x48] sm:$0xff]  ;;  %v330_v30 = vld [vmem:[#allocation6 + $0x40] sm:$0xff]  ;;  %v329_v31 = vld [vmem:[#allocation6 + $0x38] sm:$0xff] }
  0x5d   : > { %572 = vmatprep.subr.mxu0 %v813_v23  ;;  %v328_v32 = vld [vmem:[#allocation6 + $0x30] sm:$0xff]  ;;  %v327_v33 = vld [vmem:[#allocation6 + $0x28] sm:$0xff]  ;;  %v326_v34 = vld [vmem:[#allocation6 + $0x20] sm:$0xff] }
  0x5e   : > { %573 = vmatpush3.msra.mxu0 %v336_v24  ;;  %v325_v35 = vld [vmem:[#allocation6 + $0x18] sm:$0xff]  ;;  %v324_v36 = vld [vmem:[#allocation6 + $0x10] sm:$0xff]  ;;  %v323_v38 = vld [vmem:[#allocation6 + $0x8] sm:$0xff] }
  0x5f   : > { %574 = vmatprep.subr.mxu0 %v813_v23  ;;  %v322_v39 = vld [vmem:[#allocation6] sm:$0xff]  ;;  %v547_v41 = vld [vmem:[%s990_s2] ss:$0 sm:$0xff] }
  0x60   : > { %575 = vmatpush3.msra.mxu0 %v335_v25  ;;  %v320_v37 = vld [vmem:[#allocation2] sm:$0x3] }
  0x61   : > { %576 = vmatprep.subr.mxu0 %v813_v23  ;;  %v321_v40 = vmul.f32 0.015625, %v320_v37  ;;  %v415_v43 = vld [vmem:[%s991_s3] sm:$0x3] }
  0x62   : > { %577 = vmatpush3.msra.mxu0 %v334_v26  ;;  %v425_v48 = vmul.f32 %v415_v43, %v415_v43 }
  0x63   : > { %578 = vmatprep.subr.mxu0 %v813_v23 }
  0x64   : > { %579 = vmatpush3.msra.mxu0 %v333_v27  ;;  %v426_v51 = vsel %vm417_vm2, %v425_v48, 0.0 }
  0x65   : > { %580 = vmatprep.subr.mxu0 %v813_v23 }
  0x66   : > { %581 = vmatpush3.msra.mxu0 %v332_v28 }
  0x67   : > { %582 = vmatprep.subr.mxu0 %v813_v23 }
  0x68   : > { %583 = vmatpush3.msra.mxu0 %v331_v29 }
  0x69   : > { %584 = vmatprep.subr.mxu0 %v813_v23 }
  0x6a   : > { %585 = vmatpush3.msra.mxu0 %v330_v30 }
  0x6b   : > { %586 = vmatprep.subr.mxu0 %v813_v23 }
  0x6c   : > { %587 = vmatpush3.msra.mxu0 %v329_v31 }
  0x6d   : > { %588 = vmatprep.subr.mxu0 %v813_v23 }
  0x6e   : > { %589 = vmatpush3.msra.mxu0 %v328_v32 }
  0x6f   : > { %590 = vmatprep.subr.mxu0 %v813_v23 }
  0x70   : > { %591 = vmatpush3.msra.mxu0 %v327_v33 }
  0x71   : > { %592 = vmatprep.subr.mxu0 %v813_v23 }
  0x72   : > { %593 = vmatpush3.msra.mxu0 %v326_v34 }
  0x73   : > { %594 = vmatprep.subr.mxu0 %v813_v23 }
  0x74   : > { %595 = vmatpush3.msra.mxu0 %v325_v35 }
  0x75   : > { %596 = vmatprep.subr.mxu0 %v813_v23 }
  0x76   : > { %597 = vmatpush3.msra.mxu0 %v324_v36 }
  0x77   : > { %598 = vmatprep.subr.mxu0 %v813_v23 }
  0x78   : > { %599 = vmatpush3.msra.mxu0 %v323_v38 }
  0x79   : > { %600 = vmatprep.subr.mxu0 %v813_v23 }
  0x7a   : > { %601 = vmatpush3.msra.mxu0 %v322_v39 }
  0x7b   : > { %603 = vmatmul.mubr.f32.vlgmr.msra.gmra.mxu0 %v321_v40 }
 0x13b   : > { %v411_v42 = vpop.f32.mrf.mxu0 }
 0x13c   : > { %v412_v44 = vadd.f32 %v547_v41, %v411_v42 }
 0x13d   : > { %v604_v45 = vpop.f32.mrf.mxu0 }
 0x13e   : > { %v421_v46 = vmul.f32 %v412_v44, %v412_v44  ;;  %v416_v47 = vmul.f32 %v415_v43, %v412_v44 }
 0x140   : > { %v422_v49 = vsel %vm417_vm2, %v421_v46, 0.0  ;;  %v418_v50 = vsel %vm417_vm2, %v416_v47, 0.0 }
 0x141   : > { %423 = vadd.xlane.f32.xlu0 %v422_v49  ;;  %419 = vadd.xlane.f32.xlu1 %v418_v50 }
 0x145   : > { %427 = vadd.xlane.f32.xlu0 %v426_v51 }
 0x1ca   : > { %v424_v52 = vpop.xlane.xlu0 %423  ;;  %v420_v57 = vpop.xlane.xlu1 %419 }
 0x1ce   : > { %v428_v53 = vpop.xlane.xlu0 %427 }
 0x1cf   : > { %v429_v54 = vmul.f32 %v428_v53, %v424_v52 }
 0x1d1   : > { %v430_v55 = vmax.f32 %v429_v54, 1e-16 }
 0x1d3   : > { %691 = vrsqrt.f32 %v430_v55 }
 0x1e0   : > { %v692_v56 = vpop.eup %691 }
 0x1e1   : > { %v432_v58 = vmul.f32 %v692_v56, %v420_v57 }
 0x1e3   : > { %433 = vst [vmem:[#allocation8] sm:$0x3] %v432_v58 }
 0x1e4 PF: > { %p955_p10 = scmp.eq.s32.totalorder %s532_s21, 3  ;;  %s815_s11 = smov [#allocation8]  }
 0x1e5   : > { %s443_s23 = sshll.u32 %s815_s11, 4  ;;  %s444_s23 = int_to_ptr.vmem [resolvable:$true] %s443_s23 }
 0x1e6   : > { %s719_s5 = scalar_lea.vmem %s444_s23, 32  ;;  %p726_p0 = scmp.lt.s32.totalorder %s444_s23, %s444_s23 }
 0x1e7   : > { %p720_p11 = scmp.ne.s32.totalorder %s444_s23, %s719_s5  ;;  %p727_p1 = scmp.lt.s32.totalorder %s719_s5, %s719_s5 }
 0x1e9   : > { %p721_p12 = pnand %p720_p11, %p955_p10  ;;  %p728_p2 = por %p727_p1, %p726_p0 }
 0x1eb   : > { %p722_p13 = pneg %p721_p12 }
 0x1ed   : > { %p729_p4 = pnand %p728_p2, %p722_p13 }
 0x1ef   : > { %732 = shalt.err (!%p729_p4)
}
 0x1f0   : > { %619 = dma.vmem_to_hbm [thread:$0]  (%p955_p10), %s444_s23, 32, %s992_s4, [#allocation5]  }
 0x1f1   : > { %776 = dma.done.wait (%p955_p10), [#allocation5], 32  }
 0x1f2   : > { %778 = vsyncadd (%p955_p10), [#allocation5], 4294967264 }
 0x1f3 PF: > { %s19_s20 = sadd.s32 1, %s801_s20   ;;  %s1000_s15 = smov %s785_s16 }
 0x1f4   : > { %p16_p6 = scmp.ge.s32.totalorder %s19_s20, 6   ;;  %s1001_s16 = smov %s789_s17 }
 0x1f5   : > { %s1002_s17 = smov %s899_s28  ;;  %s1003_s18 = smov %s797_s19 }
 0x1f6   : > { %s1004_s19 = smov %s1006_s22  ;;  %18 = sbr.rel (!%p16_p6) target bundleno = 6 (0x6), region = 94 }
 0x1fb   :  { %456 = vsyncpa [#allocation4], 1 }
 0x1fc   :  { %458 = vsyncpa [#allocation4 + $0x1], 1 }
 0x1fd   :  { %459 = vsyncpa [#allocation7], 1 }
 0x1fe   :  { %460 = vsyncpa [#allocation5], 1 }
 0x1ff   :  { %462 = vsyncpa [#allocation5 + $0x1], 1 }

</bundles_post_ra>
